<compile_context>
chip_gen: v5e
topology: v5e:2x2
jax: 0.10.0
libtpu: 0.0.40
codegen_flags: <defaults>
</compile_context>

<pallas_src>
import jax
import jax.numpy as jnp
import numpy as np
from jax.experimental import pallas as pl
from jax.experimental.pallas import tpu as pltpu


# ----------------------------- Pallas kernel -----------------------------

def _coda_prompt_kernel(xq_ref, ank_ref, a2_ref, p_ref, out_ref):
    """Per batch tile:
         num    = xq @ (A*n_K)^T            (MXU, contract on D, f32)
         sqnorm = (xq*xq) @ (A*A)^T         (MXU, contract on D, f32)
         aq_k   = num * rsqrt(max(sqnorm, eps^2))   (VPU + EUP)
         out    = aq_k @ p_flat             (MXU, contract on Kp_pad)
    Padded Kp rows have AnK = A2 = p = 0, so num = sqnorm = 0 and the clamp
    turns 0 * rsqrt(eps^2) into exactly 0 — padded rows contribute nothing.
    """
    eps = jnp.float32(1e-12)                       # torch F.normalize default

    xq = xq_ref[...]                               # (TB, D)      f32
    ank = ank_ref[...]                             # (Kp_pad, D)  f32 (resident)
    a2 = a2_ref[...]                               # (Kp_pad, D)  f32 (resident)
    p = p_ref[...]                                 # (Kp_pad, E)  compute dtype (resident)

    # Contract the last axis of both operands — no in-kernel transpose.
    dn_last = (((1,), (1,)), ((), ()))

    num = jax.lax.dot_general(xq, ank, dn_last,
                              preferred_element_type=jnp.float32)       # (TB, Kp_pad)
    sqnorm = jax.lax.dot_general(xq * xq, a2, dn_last,
                                 preferred_element_type=jnp.float32)    # (TB, Kp_pad)

    # max(sqrt(s), eps) == sqrt(max(s, eps^2)); rsqrt goes to the EUP slot.
    aq_k = num * jax.lax.rsqrt(jnp.maximum(sqnorm, eps * eps))          # f32

    out_ref[...] = jax.lax.dot_general(
        aq_k.astype(p.dtype), p, (((1,), (0,)), ((), ())),
        preferred_element_type=jnp.float32)                             # (TB, E) f32


# ----------------------------- helpers -----------------------------

def _round_up(x, m):
    return ((x + m - 1) // m) * m


def _pad_rows(x, rows):
    if x.shape[0] == rows:
        return x
    pad = [(0, rows - x.shape[0])] + [(0, 0)] * (x.ndim - 1)
    return jnp.pad(x, pad)


def _vmem_capacity_bytes():
    """Physical VMEM per TensorCore; conservative fallback if the query fails."""
    try:
        info = pltpu.get_tpu_info()
        for attr in ("vmem_capacity_bytes", "vmem_size_bytes", "vmem_bytes"):
            v = getattr(info, attr, None)
            if v:
                return int(v)
    except Exception:
        pass
    return 64 << 20    # v7x per-TC size: safe lower bound across v5e/v6e/v7x


def _vmem_budget():
    """Per-generation kernel VMEM budget and scoped-VMEM limit.
    128-MiB chips (v5e/v6e): ~48 MiB budget, 64 MiB limit.
    64-MiB  chips (v7x):     ~24 MiB budget, 40 MiB limit."""
    cap = _vmem_capacity_bytes()
    budget = (cap * 3) // 8
    limit = min(cap - (8 << 20), budget + (16 << 20))
    return budget, limit


def _choose_batch_tile(B, max_tb):
    """Pick (TB, B_pad).  Preference order:
       1. a multiple-of-8 tile that divides B exactly (no pad, no out[:B] slice),
          as large as possible but giving >= 2 grid steps when that costs < 4x
          tile size (keeps both v7x TensorCores busy via the parallel grid axis);
       2. the whole batch as one full-array block (tiny / odd B, still no pad);
       3. pad B up to a multiple of a large tile (ragged tail; output sliced)."""
    max_tb = max(8, min(int(max_tb), 1024))
    top = max_tb - (max_tb % 8)
    divisors = [tb for tb in range(top, 7, -8) if B % tb == 0]
    if divisors:
        best = divisors[0]
        for tb in divisors:
            if B // tb >= 2 and tb * 4 >= best:
                return tb, B
        return best, B
    if B <= max_tb:
        return B, B               # block == full array dim: (8,128) rule satisfied
    tb = max(8, min(top, 512))
    return tb, _round_up(B, tb)


# ----------------------------- pallas_call wrapper -----------------------------

def _build_pallas_call(TB, B_pad, D, E, Kp_pad, vmem_limit, single_buffer_params):
    # Resident parameter blocks: constant index_map => DMA'd once.  Request a
    # single pipeline buffer (halves their VMEM footprint); fall back to the
    # default double-buffered spec if this Pallas version rejects it.
    pmode = dict(pipeline_mode=pl.Buffered(1)) if single_buffer_params else {}
    return pl.pallas_call(
        _coda_prompt_kernel,
        out_shape=jax.ShapeDtypeStruct((B_pad, E), jnp.float32),
        grid_spec=pltpu.PrefetchScalarGridSpec(
            num_scalar_prefetch=0,
            grid=(B_pad // TB,),
            in_specs=[
                pl.BlockSpec((TB, D), lambda i: (i, 0)),                # x tile
                pl.BlockSpec((Kp_pad, D), lambda i: (0, 0), **pmode),   # A * n_K
                pl.BlockSpec((Kp_pad, D), lambda i: (0, 0), **pmode),   # A * A
                pl.BlockSpec((Kp_pad, E), lambda i: (0, 0), **pmode),   # p_flat
            ],
            out_specs=pl.BlockSpec((TB, E), lambda i: (i, 0)),
        ),
        compiler_params=pltpu.CompilerParams(
            dimension_semantics=("parallel",),        # megacore sharding on v7x
            vmem_limit_bytes=int(vmem_limit)),
    )


def _coda_prompt_pallas(x_querry, AnK_pad, A2_pad, p_flat_pad):
    """x_querry: (B, D) f32; AnK_pad/A2_pad: (Kp_pad, D) f32;
       p_flat_pad: (Kp_pad, E) compute dtype.  Returns (B, E) f32."""
    B, D = x_querry.shape
    Kp_pad, E = p_flat_pad.shape
    p_itemsize = jnp.dtype(p_flat_pad.dtype).itemsize

    param_bytes = 2 * Kp_pad * D * 4 + Kp_pad * E * p_itemsize   # single-buffered
    budget, vmem_limit = _vmem_budget()
    per_row = 2 * (D + E) * 4          # double-buffered f32 x-tile + out-tile rows
    max_tb = max(8, (budget - param_bytes) // per_row)
    TB, B_pad = _choose_batch_tile(B, max_tb)

    xq_p = _pad_rows(x_querry, B_pad)

    try:
        call = _build_pallas_call(TB, B_pad, D, E, Kp_pad, vmem_limit, True)
        out = call(xq_p, AnK_pad, A2_pad, p_flat_pad)
    except Exception:
        # pipeline_mode / Buffered(1) unsupported on this Pallas version.
        call = _build_pallas_call(TB, B_pad, D, E, Kp_pad, vmem_limit, False)
        out = call(xq_p, AnK_pad, A2_pad, p_flat_pad)

    # TODO(synk): the ragged-tail fallback still pads + slices; an in-kernel
    # masked store of the last tile would avoid the extra (B,E) HBM pass.
    return out if B_pad == B else out[:B]


# --------------------------- Module (parameters + glue) ---------------------------

class CodaPromptPE:
    KP_ALIGN = 128   # pad selected pool size to the lane width (MXU N/K efficiency)

    def __init__(self, emb_d, n_tasks, prompt_param, key_dim=768, mask_ratio=0.75,
                 seed=0, p_dtype=jnp.bfloat16):
        self.task_count = 0
        self.emb_d = emb_d
        self.key_d = key_dim
        self.n_tasks = n_tasks
        self.e_pool_size = int(prompt_param[0])
        self.e_p_length = int(prompt_param[1])
        self.ortho_mu = float(prompt_param[2])
        self.e_layers = [0, 1, 2, 3, 4]
        self.mask_ratio = mask_ratio
        # dtype of the large p_flat matmul operand (bf16 halves its HBM/VMEM bytes
        # and doubles MXU rate on v6e/v7x); A*n_K / A*A stay f32, accumulation is f32.
        self.p_dtype = p_dtype
        self._param_cache = {}

        # Deterministic parameter init. The reference gram_schmidt fills rows
        # [task_count*pt, (task_count+1)*pt) with orthonormalized random Gaussian
        # vectors and leaves the rest zero; QR of a random Gaussian matrix is
        # equivalent up to signs.
        key = jax.random.PRNGKey(seed)
        self.params = {}
        pt = self.e_pool_size // self.n_tasks
        s, f = 0, pt  # task_count == 0 at init
        for e in self.e_layers:
            key, kp, kk, ka = jax.random.split(key, 4)
            p = self._gs_init(kp, self.e_pool_size, self.e_p_length * self.emb_d, s, f)
            p = p.reshape(self.e_pool_size, self.e_p_length, self.emb_d)
            k = self._gs_init(kk, self.e_pool_size, self.key_d, s, f)
            a = self._gs_init(ka, self.e_pool_size, self.key_d, s, f)
            self.params[f'e_p_{e}'] = p
            self.params[f'e_k_{e}'] = k
            self.params[f'e_a_{e}'] = a
        # TODO(synk): LRG_layers (Conv1d align + generative stack) are never called in
        # CodaPrompt_PE.forward; their weights are not materialized here.

    @staticmethod
    def _gs_init(key, pool, dim, s, f):
        g = jax.random.normal(key, (dim, f - s), dtype=jnp.float32)
        q, _ = jnp.linalg.qr(g)                      # orthonormal columns
        uu = jnp.zeros((dim, pool), dtype=jnp.float32)
        uu = uu.at[:, s:f].set(q)
        return uu.T                                  # (pool, dim)

    def _precomputed(self, l):
        """Per-layer, parameter-only precompute, cached across forward calls:
        row slicing, K-normalization, A*n_K, A*A, p flattening, Kp padding to a
        128 multiple and the p_flat dtype cast all happen once per (layer, task)."""
        key = (l, self.task_count, jnp.dtype(self.p_dtype).name)
        hit = self._param_cache.get(key)
        if hit is not None:
            return hit

        eps = jnp.float32(1e-12)
        pt = self.e_pool_size // self.n_tasks
        f = (self.task_count + 1) * pt
        # Forward values of the PyTorch train path (detach + concat) and eval path
        # both reduce to [:f].
        # TODO(synk): training parity would additionally need stop_gradient on the
        # earlier-task rows K[:s] / A[:s] / p[:s].
        K = self.params[f'e_k_{l}'][:f]
        A = self.params[f'e_a_{l}'][:f]
        p = self.params[f'e_p_{l}'][:f]
        Kp, L, Dp = p.shape

        # K-norm clamp lives here; the (x*A)-norm clamp lives in the kernel — two
        # separate clamps, matching torch.nn.functional.normalize exactly.
        n_K = K / jnp.maximum(jnp.linalg.norm(K, axis=1, keepdims=True), eps)
        AnK = (A * n_K).astype(jnp.float32)                  # (Kp, D) small, keep f32
        A2 = (A * A).astype(jnp.float32)                     # (Kp, D) small, keep f32
        p_flat = p.reshape(Kp, L * Dp).astype(self.p_dtype)  # big operand, lane-dense E

        Kp_pad = _round_up(max(Kp, self.KP_ALIGN), self.KP_ALIGN)
        entry = (_pad_rows(AnK, Kp_pad), _pad_rows(A2, Kp_pad),
                 _pad_rows(p_flat, Kp_pad), L, Dp)
        self._param_cache[key] = entry
        return entry

    def forward(self, x_querry, l, x_block, train=False):
        if l not in self.e_layers:
            return None, 0.0, x_block

        AnK_pad, A2_pad, p_flat_pad, L, Dp = self._precomputed(l)
        B = x_querry.shape[0]

        out_flat = _coda_prompt_pallas(
            x_querry.astype(jnp.float32), AnK_pad, A2_pad, p_flat_pad)   # (B, L*Dp) f32
        P_ = out_flat.reshape(B, L, Dp)

        i = L // 2
        Ek = P_[:, :i, :]
        Ev = P_[:, i:, :]

        if train and self.ortho_mu > 0:
            pt = self.e_pool_size // self.n_tasks
            f = (self.task_count + 1) * pt
            K = self.params[f'e_k_{l}'][:f]
            A = self.params[f'e_a_{l}'][:f]
            p = self.params[f'e_p_{l}'][:f]
            loss = (self._ortho_penalty(K) + self._ortho_penalty(A)
                    + self._ortho_penalty(p.reshape(f, -1))) * self.ortho_mu
        else:
            loss = 0.0
        return [Ek, Ev], loss, x_block

    @staticmethod
    def _ortho_penalty(t):
        g = t @ t.T - jnp.eye(t.shape[0], dtype=t.dtype)
        return jnp.mean(g * g)


# ------------------------------ Pure-JAX reference ------------------------------

def _reference_forward(x_querry, K, A, p):
    eps = 1e-12
    aq = jnp.einsum('bd,kd->bkd', x_querry, A)
    n_K = K / jnp.maximum(jnp.linalg.norm(K, axis=1, keepdims=True), eps)
    q = aq / jnp.maximum(jnp.linalg.norm(aq, axis=2, keepdims=True), eps)
    aq_k = jnp.einsum('bkd,kd->bk', q, n_K)
    return jnp.einsum('bk,kld->bld', aq_k, p)


# ------------------------------------ main ------------------------------------

if __name__ == "__main__":
    # Small, module-consistent shapes:
    #   emb_d = 32, key_d = 32, e_pool_size = 8, e_p_length = 8, n_tasks = 2, B = 2
    emb_d, key_d = 32, 32
    prompt_param = (8, 8, 0.0)       # (e_pool_size, e_p_length, ortho_mu)
    n_tasks = 2
    B = 2
    layer = 0

    key = jax.random.PRNGKey(0)
    kq, kb, kq2 = jax.random.split(key, 3)
    x_querry = jax.random.normal(kq, (B, key_d), dtype=jnp.float32)
    x_block = jax.random.normal(kb, (B, 16, emb_d), dtype=jnp.float32)
    x_querry_big = jax.random.normal(kq2, (16, key_d), dtype=jnp.float32)  # multi-tile grid

    # ---- f32 p_flat path: exact parity with the PyTorch einsum chain ----
    module_f32 = CodaPromptPE(emb_d, n_tasks, prompt_param, key_dim=key_d, seed=0,
                              p_dtype=jnp.float32)
    (p_ret, loss, x_block_out) = module_f32.forward(x_querry, layer, x_block, train=False)
    Ek, Ev = p_ret
    jax.block_until_ready(Ek)
    jax.block_until_ready(Ev)

    pt = module_f32.e_pool_size // module_f32.n_tasks
    f = (module_f32.task_count + 1) * pt
    Kp = module_f32.params[f'e_k_{layer}'][:f]
    Ap = module_f32.params[f'e_a_{layer}'][:f]
    pp = module_f32.params[f'e_p_{layer}'][:f]
    P_ref = _reference_forward(x_querry, Kp, Ap, pp)
    i = module_f32.e_p_length // 2
    np.testing.assert_allclose(np.asarray(Ek), np.asarray(P_ref[:, :i, :]),
                               rtol=1e-5, atol=1e-5)
    np.testing.assert_allclose(np.asarray(Ev), np.asarray(P_ref[:, i:, :]),
                               rtol=1e-5, atol=1e-5)

    # Second call on the same module exercises the parameter cache.
    (p_ret2, _, _) = module_f32.forward(x_querry, layer, x_block, train=False)
    np.testing.assert_allclose(np.asarray(p_ret2[0]), np.asarray(Ek), rtol=0, atol=0)

    # Larger batch: multi-step grid (exercises the "parallel" batch tiling).
    (p_ret_big, _, _) = module_f32.forward(x_querry_big, layer, x_block, train=False)
    P_ref_big = _reference_forward(x_querry_big, Kp, Ap, pp)
    np.testing.assert_allclose(np.asarray(p_ret_big[0]), np.asarray(P_ref_big[:, :i, :]),
                               rtol=1e-5, atol=1e-5)
    np.testing.assert_allclose(np.asarray(p_ret_big[1]), np.asarray(P_ref_big[:, i:, :]),
                               rtol=1e-5, atol=1e-5)

    # ---- default bf16 p_flat path (halved p/HBM bytes, 2x MXU on v6e/v7x);
    #      AnK/A2 stay f32 so the cosine weights keep near-f32 precision. ----
    module_bf16 = CodaPromptPE(emb_d, n_tasks, prompt_param, key_dim=key_d, seed=0)
    (p_ret_b, _, _) = module_bf16.forward(x_querry, layer, x_block, train=False)
    Ek_b, Ev_b = p_ret_b
    jax.block_until_ready(Ek_b)
    np.testing.assert_allclose(np.asarray(Ek_b), np.asarray(P_ref[:, :i, :]),
                               rtol=2e-2, atol=2e-2)
    np.testing.assert_allclose(np.asarray(Ev_b), np.asarray(P_ref[:, i:, :]),
                               rtol=2e-2, atol=2e-2)

    print("KERNEL_OK")
</pallas_src>

<mosaic_0001>
module attributes {stable_mosaic.version = 11 : i64} {
  func.func @_coda_prompt_kernel(%arg0: i32, %arg1: memref<2x32xf32, #tpu.memory_space<vmem>>, %arg2: memref<128x32xf32, #tpu.memory_space<vmem>>, %arg3: memref<128x32xf32, #tpu.memory_space<vmem>>, %arg4: memref<128x256xf32, #tpu.memory_space<vmem>>, %arg5: memref<2x256xf32, #tpu.memory_space<vmem>>) attributes {dimension_semantics = [#tpu.dimension_semantics<parallel>], iteration_bounds = array<i64: 1>, scalar_prefetch = 0 : i64, scratch_operands = 0 : i64, tpu.core_type = #tpu.core_type<tc>, window_params = [{transform_indices = @transform_0, window_bounds = array<i64: 2, 32>}, {pipeline_mode = #tpu.pipeline_mode<synchronous>, transform_indices = @transform_1, window_bounds = array<i64: 128, 32>}, {pipeline_mode = #tpu.pipeline_mode<synchronous>, transform_indices = @transform_2, window_bounds = array<i64: 128, 32>}, {pipeline_mode = #tpu.pipeline_mode<synchronous>, transform_indices = @transform_3, window_bounds = array<i64: 128, 256>}, {transform_indices = @transform_4, window_bounds = array<i64: 2, 256>}]} {
    %c0 = arith.constant 0 : index
    %c0_0 = arith.constant 0 : index
    %0 = vector.load %arg1[%c0, %c0_0] : memref<2x32xf32, #tpu.memory_space<vmem>>, vector<2x32xf32>
    %c0_1 = arith.constant 0 : index
    %c0_2 = arith.constant 0 : index
    %1 = vector.load %arg2[%c0_1, %c0_2] : memref<128x32xf32, #tpu.memory_space<vmem>>, vector<128x32xf32>
    %c0_3 = arith.constant 0 : index
    %c0_4 = arith.constant 0 : index
    %2 = vector.load %arg3[%c0_3, %c0_4] : memref<128x32xf32, #tpu.memory_space<vmem>>, vector<128x32xf32>
    %c0_5 = arith.constant 0 : index
    %c0_6 = arith.constant 0 : index
    %3 = vector.load %arg4[%c0_5, %c0_6] : memref<128x256xf32, #tpu.memory_space<vmem>>, vector<128x256xf32>
    %cst = arith.constant dense<0.000000e+00> : vector<2x128xf32>
    %4 = tpu.matmul %0, %1, %cst {dimension_numbers = #tpu.dot_dimension_numbers<[1], [1], [0], [0], [0, 0, 1, 0], [], []>} : vector<2x32xf32>, vector<128x32xf32>, vector<2x128xf32> -> vector<2x128xf32>
    %5 = arith.mulf %0, %0 : vector<2x32xf32>
    %cst_7 = arith.constant dense<0.000000e+00> : vector<2x128xf32>
    %6 = tpu.matmul %5, %2, %cst_7 {dimension_numbers = #tpu.dot_dimension_numbers<[1], [1], [0], [0], [0, 0, 1, 0], [], []>} : vector<2x32xf32>, vector<128x32xf32>, vector<2x128xf32> -> vector<2x128xf32>
    %cst_8 = arith.constant 9.99999996E-13 : f32
    %cst_9 = arith.constant 9.99999996E-13 : f32
    %7 = arith.mulf %cst_8, %cst_9 : f32
    %8 = vector.broadcast %7 : f32 to vector<2x128xf32>
    %9 = arith.maximumf %6, %8 : vector<2x128xf32>
    %10 = math.rsqrt %9 : vector<2x128xf32>
    %11 = arith.mulf %4, %10 : vector<2x128xf32>
    %cst_10 = arith.constant dense<0.000000e+00> : vector<2x256xf32>
    %12 = tpu.matmul %11, %3, %cst_10 {dimension_numbers = #tpu.dot_dimension_numbers<[1], [0], [0], [1], [0, 0, 1, 1], [], []>} : vector<2x128xf32>, vector<128x256xf32>, vector<2x256xf32> -> vector<2x256xf32>
    %c0_11 = arith.constant 0 : index
    %c0_12 = arith.constant 0 : index
    %13 = vector.load %arg5[%c0_11, %c0_12] : memref<2x256xf32, #tpu.memory_space<vmem>>, vector<2x256xf32>
    tpu.vector_store %arg5[%c0_11, %c0_12], %12 {strides = array<i32>} : memref<2x256xf32, #tpu.memory_space<vmem>>, vector<2x256xf32>,
    return
  }
  func.func @transform_0(%arg0: i32) -> (i32, i32) {
    %c0_i32 = arith.constant 0 : i32
    %c0_i32_0 = arith.constant 0 : i32
    return %arg0, %c0_i32 : i32, i32
  }
  func.func @transform_1(%arg0: i32) -> (i32, i32) {
    %c0_i32 = arith.constant 0 : i32
    %c0_i32_0 = arith.constant 0 : i32
    %c0_i32_1 = arith.constant 0 : i32
    return %c0_i32, %c0_i32_0 : i32, i32
  }
  func.func @transform_2(%arg0: i32) -> (i32, i32) {
    %c0_i32 = arith.constant 0 : i32
    %c0_i32_0 = arith.constant 0 : i32
    %c0_i32_1 = arith.constant 0 : i32
    return %c0_i32, %c0_i32_0 : i32, i32
  }
  func.func @transform_3(%arg0: i32) -> (i32, i32) {
    %c0_i32 = arith.constant 0 : i32
    %c0_i32_0 = arith.constant 0 : i32
    %c0_i32_1 = arith.constant 0 : i32
    return %c0_i32, %c0_i32_0 : i32, i32
  }
  func.func @transform_4(%arg0: i32) -> (i32, i32) {
    %c0_i32 = arith.constant 0 : i32
    %c0_i32_0 = arith.constant 0 : i32
    return %arg0, %c0_i32 : i32, i32
  }
}

module attributes {stable_mosaic.version = 11 : i64} {
  func.func @_coda_prompt_kernel(%arg0: i32, %arg1: memref<2x32xf32, #tpu.memory_space<vmem>>, %arg2: memref<128x32xf32, #tpu.memory_space<vmem>>, %arg3: memref<128x32xf32, #tpu.memory_space<vmem>>, %arg4: memref<128x256xf32, #tpu.memory_space<vmem>>, %arg5: memref<2x256xf32, #tpu.memory_space<vmem>>) attributes {dimension_semantics = [#tpu.dimension_semantics<parallel>], iteration_bounds = array<i64: 1>, scalar_prefetch = 0 : i64, scratch_operands = 0 : i64, tpu.core_type = #tpu.core_type<tc>, window_params = [{transform_indices = @transform_0, window_bounds = array<i64: 2, 32>}, {pipeline_mode = #tpu.pipeline_mode<synchronous>, transform_indices = @transform_1, window_bounds = array<i64: 128, 32>}, {pipeline_mode = #tpu.pipeline_mode<synchronous>, transform_indices = @transform_2, window_bounds = array<i64: 128, 32>}, {pipeline_mode = #tpu.pipeline_mode<synchronous>, transform_indices = @transform_3, window_bounds = array<i64: 128, 256>}, {transform_indices = @transform_4, window_bounds = array<i64: 2, 256>}]} {
    %c0 = arith.constant 0 : index
    %c0_0 = arith.constant 0 : index
    %0 = vector.load %arg1[%c0, %c0_0] : memref<2x32xf32, #tpu.memory_space<vmem>>, vector<2x32xf32>
    %c0_1 = arith.constant 0 : index
    %c0_2 = arith.constant 0 : index
    %1 = vector.load %arg2[%c0_1, %c0_2] : memref<128x32xf32, #tpu.memory_space<vmem>>, vector<128x32xf32>
    %c0_3 = arith.constant 0 : index
    %c0_4 = arith.constant 0 : index
    %2 = vector.load %arg3[%c0_3, %c0_4] : memref<128x32xf32, #tpu.memory_space<vmem>>, vector<128x32xf32>
    %c0_5 = arith.constant 0 : index
    %c0_6 = arith.constant 0 : index
    %3 = vector.load %arg4[%c0_5, %c0_6] : memref<128x256xf32, #tpu.memory_space<vmem>>, vector<128x256xf32>
    %cst = arith.constant dense<0.000000e+00> : vector<2x128xf32>
    %4 = tpu.matmul %0, %1, %cst {dimension_numbers = #tpu.dot_dimension_numbers<[1], [1], [0], [0], [0, 0, 1, 0], [], []>} : vector<2x32xf32>, vector<128x32xf32>, vector<2x128xf32> -> vector<2x128xf32>
    %5 = arith.mulf %0, %0 : vector<2x32xf32>
    %cst_7 = arith.constant dense<0.000000e+00> : vector<2x128xf32>
    %6 = tpu.matmul %5, %2, %cst_7 {dimension_numbers = #tpu.dot_dimension_numbers<[1], [1], [0], [0], [0, 0, 1, 0], [], []>} : vector<2x32xf32>, vector<128x32xf32>, vector<2x128xf32> -> vector<2x128xf32>
    %cst_8 = arith.constant 9.99999996E-13 : f32
    %cst_9 = arith.constant 9.99999996E-13 : f32
    %7 = arith.mulf %cst_8, %cst_9 : f32
    %8 = vector.broadcast %7 : f32 to vector<2x128xf32>
    %9 = arith.maximumf %6, %8 : vector<2x128xf32>
    %10 = math.rsqrt %9 : vector<2x128xf32>
    %11 = arith.mulf %4, %10 : vector<2x128xf32>
    %cst_10 = arith.constant dense<0.000000e+00> : vector<2x256xf32>
    %12 = tpu.matmul %11, %3, %cst_10 {dimension_numbers = #tpu.dot_dimension_numbers<[1], [0], [0], [1], [0, 0, 1, 1], [], []>} : vector<2x128xf32>, vector<128x256xf32>, vector<2x256xf32> -> vector<2x256xf32>
    %c0_11 = arith.constant 0 : index
    %c0_12 = arith.constant 0 : index
    %13 = vector.load %arg5[%c0_11, %c0_12] : memref<2x256xf32, #tpu.memory_space<vmem>>, vector<2x256xf32>
    tpu.vector_store %arg5[%c0_11, %c0_12], %12 {strides = array<i32>} : memref<2x256xf32, #tpu.memory_space<vmem>>, vector<2x256xf32>,
    return
  }
  func.func @transform_0(%arg0: i32) -> (i32, i32) {
    %c0_i32 = arith.constant 0 : i32
    %c0_i32_0 = arith.constant 0 : i32
    return %arg0, %c0_i32 : i32, i32
  }
  func.func @transform_1(%arg0: i32) -> (i32, i32) {
    %c0_i32 = arith.constant 0 : i32
    %c0_i32_0 = arith.constant 0 : i32
    %c0_i32_1 = arith.constant 0 : i32
    return %c0_i32, %c0_i32_0 : i32, i32
  }
  func.func @transform_2(%arg0: i32) -> (i32, i32) {
    %c0_i32 = arith.constant 0 : i32
    %c0_i32_0 = arith.constant 0 : i32
    %c0_i32_1 = arith.constant 0 : i32
    return %c0_i32, %c0_i32_0 : i32, i32
  }
  func.func @transform_3(%arg0: i32) -> (i32, i32) {
    %c0_i32 = arith.constant 0 : i32
    %c0_i32_0 = arith.constant 0 : i32
    %c0_i32_1 = arith.constant 0 : i32
    return %c0_i32, %c0_i32_0 : i32, i32
  }
  func.func @transform_4(%arg0: i32) -> (i32, i32) {
    %c0_i32 = arith.constant 0 : i32
    %c0_i32_0 = arith.constant 0 : i32
    return %arg0, %c0_i32 : i32, i32
  }
}

</mosaic_0001>

<bundles_post_ra>
// kernel: tpu_custom_call.1
= control target key start
LH: loop header
LB: loop body
LE: loop exit
PB: predicated region body
PF: predicated region fallthrough
CT: control target
= control target key end

     0   :  { %vm83_vm0 = vcmask 261120   ;;  %s623_s0 = inlined_call_operand.vmem [shape: f32[2,32], index: 0, kind: input, shape index: {}]   ;;  %s624_s1 = inlined_call_operand.vmem [shape: f32[128,32], index: 1, kind: input, shape index: {}]   ;;  %s625_s2 = inlined_call_operand.vmem [shape: f32[128,32], index: 2, kind: input, shape index: {}]   ;;  %s626_s3 = inlined_call_operand.vmem [shape: f32[128,256], index: 3, kind: input, shape index: {}]   ;;  %s627_s4 = inlined_call_operand.hbm [shape: f32[2,256], index: 4, kind: output, shape index: {}]  }
   0x1   :  { %v50_v0 = vld [vmem:[%s625_s2 + $0x78] sm:$0xff]  ;;  %v49_v2 = vld [vmem:[%s625_s2 + $0x70] sm:$0xff] }
   0x2   :  { %319 = vmatpush.xpose.msk.msra.mxu1 %vm83_vm0, %v50_v0  ;;  %v34_v1 = vld [vmem:[%s624_s1 + $0x78] sm:$0xff]  ;;  %v33_v3 = vld [vmem:[%s624_s1 + $0x70] sm:$0xff] }
   0x3   :  { %302 = vmatpush.xpose.msk.msra.mxu0 %vm83_vm0, %v34_v1 }
   0x6   :  { %320 = vmatpush.xpose.msk.msra.mxu1 %vm83_vm0, %v49_v2 }
   0x7   :  { %9 = vsyncpa [#allocation3], 0  ;;  %v48_v4 = vld [vmem:[%s625_s2 + $0x68] sm:$0xff]  ;;  %303 = vmatpush.xpose.msk.msra.mxu0 %vm83_vm0, %v33_v3  ;;  %v47_v6 = vld [vmem:[%s625_s2 + $0x60] sm:$0xff]  ;;  %s293_s12 = sshll.u32 %s627_s4, 4  ;;  %vm282_vm4 = vcmask 1041408   ;;  %s294_s12 = int_to_ptr.hbm [resolvable:$true] %s293_s12 }
   0x8   :  { %v32_v5 = vld [vmem:[%s624_s1 + $0x68] sm:$0xff]  ;;  %v31_v7 = vld [vmem:[%s624_s1 + $0x60] sm:$0xff]  ;;  %v46_v8 = vld [vmem:[%s625_s2 + $0x58] sm:$0xff] }
   0x9   :  { %v30_v9 = vld [vmem:[%s624_s1 + $0x58] sm:$0xff]  ;;  %v45_v10 = vld [vmem:[%s625_s2 + $0x50] sm:$0xff]  ;;  %v44_v12 = vld [vmem:[%s625_s2 + $0x48] sm:$0xff] }
   0xa   :  { %321 = vmatpush.xpose.msk.msra.mxu1 %vm83_vm0, %v48_v4  ;;  %v29_v11 = vld [vmem:[%s624_s1 + $0x50] sm:$0xff]  ;;  %v28_v13 = vld [vmem:[%s624_s1 + $0x48] sm:$0xff]  ;;  %v43_v14 = vld [vmem:[%s625_s2 + $0x40] sm:$0xff] }
   0xb   :  { %304 = vmatpush.xpose.msk.msra.mxu0 %vm83_vm0, %v32_v5  ;;  %v27_v15 = vld [vmem:[%s624_s1 + $0x40] sm:$0xff]  ;;  %v42_v16 = vld [vmem:[%s625_s2 + $0x38] sm:$0xff]  ;;  %v41_v18 = vld [vmem:[%s625_s2 + $0x30] sm:$0xff] }
   0xc   :  { %v26_v17 = vld [vmem:[%s624_s1 + $0x38] sm:$0xff]  ;;  %v81_v19 = vld [vmem:[%s626_s3 + $0xf0] sm:$0xff]  ;;  %v79_v21 = vld [vmem:[%s626_s3 + $0xe0] sm:$0xff] }
   0xd   :  { %239 = vmatpush.msra.mxu2 %v81_v19  ;;  %v82_v20 = vld [vmem:[%s626_s3 + $0xf8] sm:$0xff]  ;;  %v80_v22 = vld [vmem:[%s626_s3 + $0xe8] sm:$0xff]  ;;  %v25_v23 = vld [vmem:[%s624_s1 + $0x30] sm:$0xff] }
   0xe   :  { %322 = vmatpush.xpose.msk.msra.mxu1 %vm83_vm0, %v47_v6  ;;  %259 = vmatpush.msra.mxu3 %v82_v20  ;;  %v77_v24 = vld [vmem:[%s626_s3 + $0xd0] sm:$0xff]  ;;  %v78_v25 = vld [vmem:[%s626_s3 + $0xd8] sm:$0xff]  ;;  %v75_v26 = vld [vmem:[%s626_s3 + $0xc0] sm:$0xff] }
   0xf   :  { %305 = vmatpush.xpose.msk.msra.mxu0 %vm83_vm0, %v31_v7  ;;  %240 = vmatpush.msra.mxu2 %v79_v21  ;;  %v40_v27 = vld [vmem:[%s625_s2 + $0x28] sm:$0xff]  ;;  %v39_v30 = vld [vmem:[%s625_s2 + $0x20] sm:$0xff]  ;;  %v38_v32 = vld [vmem:[%s625_s2 + $0x18] sm:$0xff] }
  0x10   :  { %260 = vmatpush.msra.mxu3 %v80_v22  ;;  %v76_v28 = vld [vmem:[%s626_s3 + $0xc8] sm:$0xff]  ;;  %v23_v31 = vld [vmem:[%s624_s1 + $0x20] sm:$0xff]  ;;  %v22_v33 = vld [vmem:[%s624_s1 + $0x18] sm:$0xff] }
  0x11   :  { %241 = vmatpush.msra.mxu2 %v77_v24  ;;  %v24_v29 = vld [vmem:[%s624_s1 + $0x28] sm:$0xff]  ;;  %v37_v34 = vld [vmem:[%s625_s2 + $0x10] sm:$0xff]  ;;  %v18_v38 = vld [vmem:[%s623_s0] sm:$0x3] }
  0x12   :  { %323 = vmatpush.xpose.msk.msra.mxu1 %vm83_vm0, %v46_v8  ;;  %261 = vmatpush.msra.mxu3 %v78_v25  ;;  %v21_v35 = vld [vmem:[%s624_s1 + $0x10] sm:$0xff]  ;;  %v36_v36 = vld [vmem:[%s625_s2 + $0x8] sm:$0xff]  ;;  %v35_v39 = vld [vmem:[%s625_s2] sm:$0xff]  ;;  %v155_v41 = vmul.f32 %v18_v38, %v18_v38 }
  0x13   :  { %306 = vmatpush.xpose.msk.msra.mxu0 %vm83_vm0, %v30_v9  ;;  %242 = vmatpush.msra.mxu2 %v75_v26  ;;  %v20_v37 = vld [vmem:[%s624_s1 + $0x8] sm:$0xff]  ;;  %v19_v40 = vld [vmem:[%s624_s1] sm:$0xff]  ;;  %v73_v42 = vld [vmem:[%s626_s3 + $0xb0] sm:$0xff] }
  0x14   :  { %262 = vmatpush.msra.mxu3 %v76_v28  ;;  %v74_v43 = vld [vmem:[%s626_s3 + $0xb8] sm:$0xff]  ;;  %v71_v44 = vld [vmem:[%s626_s3 + $0xa0] sm:$0xff]  ;;  %v72_v45 = vld [vmem:[%s626_s3 + $0xa8] sm:$0xff] }
  0x15   :  { %243 = vmatpush.msra.mxu2 %v73_v42  ;;  %v69_v46 = vld [vmem:[%s626_s3 + $0x90] sm:$0xff]  ;;  %v70_v47 = vld [vmem:[%s626_s3 + $0x98] sm:$0xff]  ;;  %v67_v48 = vld [vmem:[%s626_s3 + $0x80] sm:$0xff] }
  0x16   :  { %324 = vmatpush.xpose.msk.msra.mxu1 %vm83_vm0, %v45_v10  ;;  %263 = vmatpush.msra.mxu3 %v74_v43  ;;  %v68_v49 = vld [vmem:[%s626_s3 + $0x88] sm:$0xff]  ;;  %v65_v50 = vld [vmem:[%s626_s3 + $0x70] sm:$0xff]  ;;  %v66_v51 = vld [vmem:[%s626_s3 + $0x78] sm:$0xff] }
  0x17   :  { %307 = vmatpush.xpose.msk.msra.mxu0 %vm83_vm0, %v29_v11  ;;  %244 = vmatpush.msra.mxu2 %v71_v44  ;;  %v63_v52 = vld [vmem:[%s626_s3 + $0x60] sm:$0xff]  ;;  %v64_v53 = vld [vmem:[%s626_s3 + $0x68] sm:$0xff]  ;;  %v61_v54 = vld [vmem:[%s626_s3 + $0x50] sm:$0xff] }
  0x18   :  { %264 = vmatpush.msra.mxu3 %v72_v45  ;;  %v62_v55 = vld [vmem:[%s626_s3 + $0x58] sm:$0xff]  ;;  %v59_v56 = vld [vmem:[%s626_s3 + $0x40] sm:$0xff]  ;;  %v60_v57 = vld [vmem:[%s626_s3 + $0x48] sm:$0xff] }
  0x19   :  { %245 = vmatpush.msra.mxu2 %v69_v46  ;;  %v57_v58 = vld [vmem:[%s626_s3 + $0x30] sm:$0xff]  ;;  %v58_v59 = vld [vmem:[%s626_s3 + $0x38] sm:$0xff]  ;;  %v55_v60 = vld [vmem:[%s626_s3 + $0x20] sm:$0xff] }
  0x1a   :  { %325 = vmatpush.xpose.msk.msra.mxu1 %vm83_vm0, %v44_v12  ;;  %265 = vmatpush.msra.mxu3 %v70_v47  ;;  %v56_v61 = vld [vmem:[%s626_s3 + $0x28] sm:$0xff]  ;;  %v53_v62 = vld [vmem:[%s626_s3 + $0x10] sm:$0xff]  ;;  %v54_v63 = vld [vmem:[%s626_s3 + $0x18] sm:$0xff] }
  0x1b   :  { %308 = vmatpush.xpose.msk.msra.mxu0 %vm83_vm0, %v28_v13  ;;  %246 = vmatpush.msra.mxu2 %v67_v48  ;;  %v51_v0 = vld [vmem:[%s626_s3] sm:$0xff]  ;;  %v52_v1 = vld [vmem:[%s626_s3 + $0x8] sm:$0xff]  ;;  %s365_s3 = smov [#allocation2]  }
  0x1c   :  { %266 = vmatpush.msra.mxu3 %v68_v49  ;;  %s291_s9 = sshll.u32 %s365_s3, 4  ;;  %s292_s9 = int_to_ptr.vmem [resolvable:$true] %s291_s9 }
  0x1d   :  { %247 = vmatpush.msra.mxu2 %v65_v50 }
  0x1e   :  { %326 = vmatpush.xpose.msk.msra.mxu1 %vm83_vm0, %v43_v14  ;;  %267 = vmatpush.msra.mxu3 %v66_v51 }
  0x1f   :  { %309 = vmatpush.xpose.msk.msra.mxu0 %vm83_vm0, %v27_v15  ;;  %248 = vmatpush.msra.mxu2 %v63_v52 }
  0x20   :  { %268 = vmatpush.msra.mxu3 %v64_v53 }
  0x21   :  { %249 = vmatpush.msra.mxu2 %v61_v54 }
  0x22   :  { %327 = vmatpush.xpose.msk.msra.mxu1 %vm83_vm0, %v42_v16  ;;  %269 = vmatpush.msra.mxu3 %v62_v55 }
  0x23   :  { %310 = vmatpush.xpose.msk.msra.mxu0 %vm83_vm0, %v26_v17  ;;  %250 = vmatpush.msra.mxu2 %v59_v56 }
  0x24   :  { %270 = vmatpush.msra.mxu3 %v60_v57 }
  0x25   :  { %251 = vmatpush.msra.mxu2 %v57_v58 }
  0x26   :  { %328 = vmatpush.xpose.msk.msra.mxu1 %vm83_vm0, %v41_v18  ;;  %271 = vmatpush.msra.mxu3 %v58_v59 }
  0x27   :  { %311 = vmatpush.xpose.msk.msra.mxu0 %vm83_vm0, %v25_v23  ;;  %252 = vmatpush.msra.mxu2 %v55_v60 }
  0x28   :  { %272 = vmatpush.msra.mxu3 %v56_v61 }
  0x29   :  { %253 = vmatpush.msra.mxu2 %v53_v62 }
  0x2a   :  { %329 = vmatpush.xpose.msk.msra.mxu1 %vm83_vm0, %v40_v27  ;;  %273 = vmatpush.msra.mxu3 %v54_v63 }
  0x2b   :  { %312 = vmatpush.xpose.msk.msra.mxu0 %vm83_vm0, %v24_v29  ;;  %254 = vmatpush.msra.mxu2 %v51_v0 }
  0x2c   :  { %274 = vmatpush.msra.mxu3 %v52_v1 }
  0x2e   :  { %330 = vmatpush.xpose.msk.msra.mxu1 %vm83_vm0, %v39_v30 }
  0x2f   :  { %313 = vmatpush.xpose.msk.msra.mxu0 %vm83_vm0, %v23_v31 }
  0x32   :  { %331 = vmatpush.xpose.msk.msra.mxu1 %vm83_vm0, %v38_v32 }
  0x33   :  { %314 = vmatpush.xpose.msk.msra.mxu0 %vm83_vm0, %v22_v33 }
  0x36   :  { %332 = vmatpush.xpose.msk.msra.mxu1 %vm83_vm0, %v37_v34 }
  0x37   :  { %315 = vmatpush.xpose.msk.msra.mxu0 %vm83_vm0, %v21_v35 }
  0x3a   :  { %333 = vmatpush.xpose.msk.msra.mxu1 %vm83_vm0, %v36_v36 }
  0x3b   :  { %316 = vmatpush.xpose.msk.msra.mxu0 %vm83_vm0, %v20_v37 }
  0x3e   :  { %334 = vmatpush.xpose.msk.msra.mxu1 %vm83_vm0, %v35_v39 }
  0x3f   :  { %317 = vmatpush.xpose.msk.msra.mxu0 %vm83_vm0, %v19_v40 }
  0x41   :  { %335 = vmatmul.msk.f32.vlgmr.msra.gmra.mxu1 %vm83_vm0, %v155_v41 }
  0x42   :  { %318 = vmatmul.msk.f32.vlgmr.msra.gmra.mxu0 %vm83_vm0, %v18_v38 }
  0xbe   :  { %v224_v2 = vpop.f32.mrf.mxu1 }
  0xbf   :  { %v227_v3 = vmax.f32 %v224_v2, 1e-24  ;;  %v152_v9 = vpop.f32.mrf.mxu0 }
  0xc1   :  { %337 = vrsqrt.f32 %v227_v3  ;;  %vm234_vm2 = vweird.f32 %v227_v3 }
  0xc7   :  { %v338_v4 = vpop.eup %337 }
  0xc8   :  { %v229_v5 = vmul.f32 %v338_v4, %v227_v3  ;;  %vm235_vm1 = vweird.f32 %v338_v4 }
  0xc9   :  { %vm236_vm3 = vmor %vm234_vm2, %vm235_vm1 }
  0xca   :  { %v230_v6 = vmul.f32 %v338_v4, %v229_v5 }
  0xcc   :  { %v231_v7 = vmul.f32 0.5, %v230_v6 }
  0xce   :  { %v232_v8 = vsub.f32 1.5, %v231_v7 }
  0xd0   :  { %v233_v10 = vmul.f32 %v338_v4, %v232_v8 }
  0xd2   :  { %v237_v11 = vsel %vm236_vm3, %v338_v4, %v233_v10 }
  0xd3   :  { %v238_v12 = vmul.f32 %v237_v11, %v152_v9 }
  0xd5   :  { %255 = vmatmul.f32.vlgmr.msra.gmra.mxu2 %v238_v12  ;;  %275 = vmatmul.f32.vlgmr.msra.gmra.mxu3 %v238_v12 }
 0x158   :  { %v276_v13 = vpop.f32.mrf.mxu3  ;;  %v256_v15 = vpop.f32.mrf.mxu2 }
 0x159   :  { %v281_v14 = vrot.slane %v276_v13, 6 }
 0x15b   :  { %v283_v16 = vsel %vm282_vm4, %v256_v15, %v281_v14 }
 0x15c   :  { %285 = vst [vmem:[#allocation2] sm:$0xf] %v283_v16 }
 0x15d   :  { %296 = dma.vmem_to_hbm [thread:$0]  %s292_s9, 64, %s294_s12, [#allocation3]  }
 0x15e   :  { %363 = dma.done.wait [#allocation3], 64  }
 0x15f   :  { %364 = vsyncadd [#allocation3], 4294967232 }
 0x160   :  { %301 = vsyncpa [#allocation3], 1 }

// kernel: tpu_custom_call.1
= control target key start
LH: loop header
LB: loop body
LE: loop exit
PB: predicated region body
PF: predicated region fallthrough
CT: control target
= control target key end

     0   :  { %vm83_vm0 = vcmask 261120   ;;  %s623_s0 = inlined_call_operand.vmem [shape: f32[2,32], index: 0, kind: input, shape index: {}]   ;;  %s624_s1 = inlined_call_operand.vmem [shape: f32[128,32], index: 1, kind: input, shape index: {}]   ;;  %s625_s2 = inlined_call_operand.vmem [shape: f32[128,32], index: 2, kind: input, shape index: {}]   ;;  %s626_s3 = inlined_call_operand.vmem [shape: f32[128,256], index: 3, kind: input, shape index: {}]   ;;  %s627_s4 = inlined_call_operand.hbm [shape: f32[2,256], index: 4, kind: output, shape index: {}]  }
   0x1   :  { %v50_v0 = vld [vmem:[%s625_s2 + $0x78] sm:$0xff]  ;;  %v49_v2 = vld [vmem:[%s625_s2 + $0x70] sm:$0xff] }
   0x2   :  { %319 = vmatpush.xpose.msk.msra.mxu1 %vm83_vm0, %v50_v0  ;;  %v34_v1 = vld [vmem:[%s624_s1 + $0x78] sm:$0xff]  ;;  %v33_v3 = vld [vmem:[%s624_s1 + $0x70] sm:$0xff] }
   0x3   :  { %302 = vmatpush.xpose.msk.msra.mxu0 %vm83_vm0, %v34_v1 }
   0x6   :  { %320 = vmatpush.xpose.msk.msra.mxu1 %vm83_vm0, %v49_v2 }
   0x7   :  { %9 = vsyncpa [#allocation3], 0  ;;  %v48_v4 = vld [vmem:[%s625_s2 + $0x68] sm:$0xff]  ;;  %303 = vmatpush.xpose.msk.msra.mxu0 %vm83_vm0, %v33_v3  ;;  %v47_v6 = vld [vmem:[%s625_s2 + $0x60] sm:$0xff]  ;;  %s293_s12 = sshll.u32 %s627_s4, 4  ;;  %vm282_vm4 = vcmask 1041408   ;;  %s294_s12 = int_to_ptr.hbm [resolvable:$true] %s293_s12 }
   0x8   :  { %v32_v5 = vld [vmem:[%s624_s1 + $0x68] sm:$0xff]  ;;  %v31_v7 = vld [vmem:[%s624_s1 + $0x60] sm:$0xff]  ;;  %v46_v8 = vld [vmem:[%s625_s2 + $0x58] sm:$0xff] }
   0x9   :  { %v30_v9 = vld [vmem:[%s624_s1 + $0x58] sm:$0xff]  ;;  %v45_v10 = vld [vmem:[%s625_s2 + $0x50] sm:$0xff]  ;;  %v44_v12 = vld [vmem:[%s625_s2 + $0x48] sm:$0xff] }
   0xa   :  { %321 = vmatpush.xpose.msk.msra.mxu1 %vm83_vm0, %v48_v4  ;;  %v29_v11 = vld [vmem:[%s624_s1 + $0x50] sm:$0xff]  ;;  %v28_v13 = vld [vmem:[%s624_s1 + $0x48] sm:$0xff]  ;;  %v43_v14 = vld [vmem:[%s625_s2 + $0x40] sm:$0xff] }
   0xb   :  { %304 = vmatpush.xpose.msk.msra.mxu0 %vm83_vm0, %v32_v5  ;;  %v27_v15 = vld [vmem:[%s624_s1 + $0x40] sm:$0xff]  ;;  %v42_v16 = vld [vmem:[%s625_s2 + $0x38] sm:$0xff]  ;;  %v41_v18 = vld [vmem:[%s625_s2 + $0x30] sm:$0xff] }
   0xc   :  { %v26_v17 = vld [vmem:[%s624_s1 + $0x38] sm:$0xff]  ;;  %v81_v19 = vld [vmem:[%s626_s3 + $0xf0] sm:$0xff]  ;;  %v79_v21 = vld [vmem:[%s626_s3 + $0xe0] sm:$0xff] }
   0xd   :  { %239 = vmatpush.msra.mxu2 %v81_v19  ;;  %v82_v20 = vld [vmem:[%s626_s3 + $0xf8] sm:$0xff]  ;;  %v80_v22 = vld [vmem:[%s626_s3 + $0xe8] sm:$0xff]  ;;  %v25_v23 = vld [vmem:[%s624_s1 + $0x30] sm:$0xff] }
   0xe   :  { %322 = vmatpush.xpose.msk.msra.mxu1 %vm83_vm0, %v47_v6  ;;  %259 = vmatpush.msra.mxu3 %v82_v20  ;;  %v77_v24 = vld [vmem:[%s626_s3 + $0xd0] sm:$0xff]  ;;  %v78_v25 = vld [vmem:[%s626_s3 + $0xd8] sm:$0xff]  ;;  %v75_v26 = vld [vmem:[%s626_s3 + $0xc0] sm:$0xff] }
   0xf   :  { %305 = vmatpush.xpose.msk.msra.mxu0 %vm83_vm0, %v31_v7  ;;  %240 = vmatpush.msra.mxu2 %v79_v21  ;;  %v40_v27 = vld [vmem:[%s625_s2 + $0x28] sm:$0xff]  ;;  %v39_v30 = vld [vmem:[%s625_s2 + $0x20] sm:$0xff]  ;;  %v38_v32 = vld [vmem:[%s625_s2 + $0x18] sm:$0xff] }
  0x10   :  { %260 = vmatpush.msra.mxu3 %v80_v22  ;;  %v76_v28 = vld [vmem:[%s626_s3 + $0xc8] sm:$0xff]  ;;  %v23_v31 = vld [vmem:[%s624_s1 + $0x20] sm:$0xff]  ;;  %v22_v33 = vld [vmem:[%s624_s1 + $0x18] sm:$0xff] }
  0x11   :  { %241 = vmatpush.msra.mxu2 %v77_v24  ;;  %v24_v29 = vld [vmem:[%s624_s1 + $0x28] sm:$0xff]  ;;  %v37_v34 = vld [vmem:[%s625_s2 + $0x10] sm:$0xff]  ;;  %v18_v38 = vld [vmem:[%s623_s0] sm:$0x3] }
  0x12   :  { %323 = vmatpush.xpose.msk.msra.mxu1 %vm83_vm0, %v46_v8  ;;  %261 = vmatpush.msra.mxu3 %v78_v25  ;;  %v21_v35 = vld [vmem:[%s624_s1 + $0x10] sm:$0xff]  ;;  %v36_v36 = vld [vmem:[%s625_s2 + $0x8] sm:$0xff]  ;;  %v35_v39 = vld [vmem:[%s625_s2] sm:$0xff]  ;;  %v155_v41 = vmul.f32 %v18_v38, %v18_v38 }
  0x13   :  { %306 = vmatpush.xpose.msk.msra.mxu0 %vm83_vm0, %v30_v9  ;;  %242 = vmatpush.msra.mxu2 %v75_v26  ;;  %v20_v37 = vld [vmem:[%s624_s1 + $0x8] sm:$0xff]  ;;  %v19_v40 = vld [vmem:[%s624_s1] sm:$0xff]  ;;  %v73_v42 = vld [vmem:[%s626_s3 + $0xb0] sm:$0xff] }
  0x14   :  { %262 = vmatpush.msra.mxu3 %v76_v28  ;;  %v74_v43 = vld [vmem:[%s626_s3 + $0xb8] sm:$0xff]  ;;  %v71_v44 = vld [vmem:[%s626_s3 + $0xa0] sm:$0xff]  ;;  %v72_v45 = vld [vmem:[%s626_s3 + $0xa8] sm:$0xff] }
  0x15   :  { %243 = vmatpush.msra.mxu2 %v73_v42  ;;  %v69_v46 = vld [vmem:[%s626_s3 + $0x90] sm:$0xff]  ;;  %v70_v47 = vld [vmem:[%s626_s3 + $0x98] sm:$0xff]  ;;  %v67_v48 = vld [vmem:[%s626_s3 + $0x80] sm:$0xff] }
  0x16   :  { %324 = vmatpush.xpose.msk.msra.mxu1 %vm83_vm0, %v45_v10  ;;  %263 = vmatpush.msra.mxu3 %v74_v43  ;;  %v68_v49 = vld [vmem:[%s626_s3 + $0x88] sm:$0xff]  ;;  %v65_v50 = vld [vmem:[%s626_s3 + $0x70] sm:$0xff]  ;;  %v66_v51 = vld [vmem:[%s626_s3 + $0x78] sm:$0xff] }
  0x17   :  { %307 = vmatpush.xpose.msk.msra.mxu0 %vm83_vm0, %v29_v11  ;;  %244 = vmatpush.msra.mxu2 %v71_v44  ;;  %v63_v52 = vld [vmem:[%s626_s3 + $0x60] sm:$0xff]  ;;  %v64_v53 = vld [vmem:[%s626_s3 + $0x68] sm:$0xff]  ;;  %v61_v54 = vld [vmem:[%s626_s3 + $0x50] sm:$0xff] }
  0x18   :  { %264 = vmatpush.msra.mxu3 %v72_v45  ;;  %v62_v55 = vld [vmem:[%s626_s3 + $0x58] sm:$0xff]  ;;  %v59_v56 = vld [vmem:[%s626_s3 + $0x40] sm:$0xff]  ;;  %v60_v57 = vld [vmem:[%s626_s3 + $0x48] sm:$0xff] }
  0x19   :  { %245 = vmatpush.msra.mxu2 %v69_v46  ;;  %v57_v58 = vld [vmem:[%s626_s3 + $0x30] sm:$0xff]  ;;  %v58_v59 = vld [vmem:[%s626_s3 + $0x38] sm:$0xff]  ;;  %v55_v60 = vld [vmem:[%s626_s3 + $0x20] sm:$0xff] }
  0x1a   :  { %325 = vmatpush.xpose.msk.msra.mxu1 %vm83_vm0, %v44_v12  ;;  %265 = vmatpush.msra.mxu3 %v70_v47  ;;  %v56_v61 = vld [vmem:[%s626_s3 + $0x28] sm:$0xff]  ;;  %v53_v62 = vld [vmem:[%s626_s3 + $0x10] sm:$0xff]  ;;  %v54_v63 = vld [vmem:[%s626_s3 + $0x18] sm:$0xff] }
  0x1b   :  { %308 = vmatpush.xpose.msk.msra.mxu0 %vm83_vm0, %v28_v13  ;;  %246 = vmatpush.msra.mxu2 %v67_v48  ;;  %v51_v0 = vld [vmem:[%s626_s3] sm:$0xff]  ;;  %v52_v1 = vld [vmem:[%s626_s3 + $0x8] sm:$0xff]  ;;  %s365_s3 = smov [#allocation2]  }
  0x1c   :  { %266 = vmatpush.msra.mxu3 %v68_v49  ;;  %s291_s9 = sshll.u32 %s365_s3, 4  ;;  %s292_s9 = int_to_ptr.vmem [resolvable:$true] %s291_s9 }
  0x1d   :  { %247 = vmatpush.msra.mxu2 %v65_v50 }
  0x1e   :  { %326 = vmatpush.xpose.msk.msra.mxu1 %vm83_vm0, %v43_v14  ;;  %267 = vmatpush.msra.mxu3 %v66_v51 }
  0x1f   :  { %309 = vmatpush.xpose.msk.msra.mxu0 %vm83_vm0, %v27_v15  ;;  %248 = vmatpush.msra.mxu2 %v63_v52 }
  0x20   :  { %268 = vmatpush.msra.mxu3 %v64_v53 }
  0x21   :  { %249 = vmatpush.msra.mxu2 %v61_v54 }
  0x22   :  { %327 = vmatpush.xpose.msk.msra.mxu1 %vm83_vm0, %v42_v16  ;;  %269 = vmatpush.msra.mxu3 %v62_v55 }
  0x23   :  { %310 = vmatpush.xpose.msk.msra.mxu0 %vm83_vm0, %v26_v17  ;;  %250 = vmatpush.msra.mxu2 %v59_v56 }
  0x24   :  { %270 = vmatpush.msra.mxu3 %v60_v57 }
  0x25   :  { %251 = vmatpush.msra.mxu2 %v57_v58 }
  0x26   :  { %328 = vmatpush.xpose.msk.msra.mxu1 %vm83_vm0, %v41_v18  ;;  %271 = vmatpush.msra.mxu3 %v58_v59 }
  0x27   :  { %311 = vmatpush.xpose.msk.msra.mxu0 %vm83_vm0, %v25_v23  ;;  %252 = vmatpush.msra.mxu2 %v55_v60 }
  0x28   :  { %272 = vmatpush.msra.mxu3 %v56_v61 }
  0x29   :  { %253 = vmatpush.msra.mxu2 %v53_v62 }
  0x2a   :  { %329 = vmatpush.xpose.msk.msra.mxu1 %vm83_vm0, %v40_v27  ;;  %273 = vmatpush.msra.mxu3 %v54_v63 }
  0x2b   :  { %312 = vmatpush.xpose.msk.msra.mxu0 %vm83_vm0, %v24_v29  ;;  %254 = vmatpush.msra.mxu2 %v51_v0 }
  0x2c   :  { %274 = vmatpush.msra.mxu3 %v52_v1 }
  0x2e   :  { %330 = vmatpush.xpose.msk.msra.mxu1 %vm83_vm0, %v39_v30 }
  0x2f   :  { %313 = vmatpush.xpose.msk.msra.mxu0 %vm83_vm0, %v23_v31 }
  0x32   :  { %331 = vmatpush.xpose.msk.msra.mxu1 %vm83_vm0, %v38_v32 }
  0x33   :  { %314 = vmatpush.xpose.msk.msra.mxu0 %vm83_vm0, %v22_v33 }
  0x36   :  { %332 = vmatpush.xpose.msk.msra.mxu1 %vm83_vm0, %v37_v34 }
  0x37   :  { %315 = vmatpush.xpose.msk.msra.mxu0 %vm83_vm0, %v21_v35 }
  0x3a   :  { %333 = vmatpush.xpose.msk.msra.mxu1 %vm83_vm0, %v36_v36 }
  0x3b   :  { %316 = vmatpush.xpose.msk.msra.mxu0 %vm83_vm0, %v20_v37 }
  0x3e   :  { %334 = vmatpush.xpose.msk.msra.mxu1 %vm83_vm0, %v35_v39 }
  0x3f   :  { %317 = vmatpush.xpose.msk.msra.mxu0 %vm83_vm0, %v19_v40 }
  0x41   :  { %335 = vmatmul.msk.f32.vlgmr.msra.gmra.mxu1 %vm83_vm0, %v155_v41 }
  0x42   :  { %318 = vmatmul.msk.f32.vlgmr.msra.gmra.mxu0 %vm83_vm0, %v18_v38 }
  0xbe   :  { %v224_v2 = vpop.f32.mrf.mxu1 }
  0xbf   :  { %v227_v3 = vmax.f32 %v224_v2, 1e-24  ;;  %v152_v9 = vpop.f32.mrf.mxu0 }
  0xc1   :  { %337 = vrsqrt.f32 %v227_v3  ;;  %vm234_vm2 = vweird.f32 %v227_v3 }
  0xc7   :  { %v338_v4 = vpop.eup %337 }
  0xc8   :  { %v229_v5 = vmul.f32 %v338_v4, %v227_v3  ;;  %vm235_vm1 = vweird.f32 %v338_v4 }
  0xc9   :  { %vm236_vm3 = vmor %vm234_vm2, %vm235_vm1 }
  0xca   :  { %v230_v6 = vmul.f32 %v338_v4, %v229_v5 }
  0xcc   :  { %v231_v7 = vmul.f32 0.5, %v230_v6 }
  0xce   :  { %v232_v8 = vsub.f32 1.5, %v231_v7 }
  0xd0   :  { %v233_v10 = vmul.f32 %v338_v4, %v232_v8 }
  0xd2   :  { %v237_v11 = vsel %vm236_vm3, %v338_v4, %v233_v10 }
  0xd3   :  { %v238_v12 = vmul.f32 %v237_v11, %v152_v9 }
  0xd5   :  { %255 = vmatmul.f32.vlgmr.msra.gmra.mxu2 %v238_v12  ;;  %275 = vmatmul.f32.vlgmr.msra.gmra.mxu3 %v238_v12 }
 0x158   :  { %v276_v13 = vpop.f32.mrf.mxu3  ;;  %v256_v15 = vpop.f32.mrf.mxu2 }
 0x159   :  { %v281_v14 = vrot.slane %v276_v13, 6 }
 0x15b   :  { %v283_v16 = vsel %vm282_vm4, %v256_v15, %v281_v14 }
 0x15c   :  { %285 = vst [vmem:[#allocation2] sm:$0xf] %v283_v16 }
 0x15d   :  { %296 = dma.vmem_to_hbm [thread:$0]  %s292_s9, 64, %s294_s12, [#allocation3]  }
 0x15e   :  { %363 = dma.done.wait [#allocation3], 64  }
 0x15f   :  { %364 = vsyncadd [#allocation3], 4294967232 }
 0x160   :  { %301 = vsyncpa [#allocation3], 1 }

</bundles_post_ra>
